<compile_context>
chip_gen: v7x
topology: tpu7x:2x2x1
jax: 0.10.0
libtpu: 0.0.40
codegen_flags: <defaults>
</compile_context>

<pallas_src>
import jax
import jax.numpy as jnp
from jax import lax
from jax.experimental import pallas as pl
from jax.experimental.pallas import tpu as pltpu
import numpy as np

# ---------------- problem sizes (small, consistent with the module) ----------
B = 8                  # batch
N_SUB = 4              # number of d-sized sub-vectors per input
D_GEN = 4              # generator dimension d (generators are (n, d, d))
D = N_SUB * D_GEN      # input feature dim = N * d = 16
H = 32                 # MLP hidden width
NGENS = 3              # number of Lie-algebra generators
GH = NGENS * H         # 96 = stacked per-generator hidden width
WCOMB_N = (1 + NGENS) * H   # 128 = lanes of the fused weight operand


# ---------------- Pallas kernel ----------------------------------------------
def symm_loss_kernel(x_ref, wcomb_ref, p_ref, o_ref):
    x = x_ref[...]               # (B, D)
    wcomb = wcomb_ref[...]       # (D, 128) = [W1 | G0^T W1 | G1^T W1 | G2^T W1]
    p = p_ref[...]               # (2, H): row 0 = b1, row 1 = w2

    b1 = p[0:1, :]               # (1, H)
    w2 = p[1:2, :]               # (1, H)

    # --- single lane-dense MXU op: forward pre-activation + generator paths --
    out = jnp.dot(x, wcomb, preferred_element_type=jnp.float32)       # (B, 128)
    z = out[:, :H] + b1                                               # (B, H)
    y = out[:, H:]                                                    # (B, GH)

    a = jnp.tanh(z)                                                   # EUP
    v = (1.0 - a * a) * w2                                            # (B, H)

    # --- dt[b, n] = sum_h v[b,h] * y[b, n*H + h]  (segmented lane-sum on MXU) -
    v3 = jnp.concatenate([v] * NGENS, axis=1)                         # (B, GH)
    prod = y * v3                                                     # (B, GH)

    i_idx = lax.broadcasted_iota(jnp.int32, (GH, NGENS), 0)
    n_idx = lax.broadcasted_iota(jnp.int32, (GH, NGENS), 1)
    seg = ((i_idx >= n_idx * H) & (i_idx < (n_idx + 1) * H)).astype(jnp.float32)
    dt = jnp.dot(prod, seg, preferred_element_type=jnp.float32)       # (B, NGENS)

    # --- single fused mean-of-squares reduction -------------------------------
    total = jnp.sum(dt * dt)
    o_ref[...] = jnp.full((1, 1), total * (1.0 / (NGENS * B)), dtype=jnp.float32)


# ---------------- plain-JAX glue ---------------------------------------------
def build_block_diag_generators(gens, n_sub):
    # gens: (n, d, d) -> Gbig: (n, N*d, N*d) with gens[n] on each diagonal block,
    # so  grads @ Gbig[n] @ x == sum_N grads[., N, :] @ gens[n] @ x[., N, :]
    n, d, _ = gens.shape
    gbig = jnp.einsum('ab,nhd->nahbd', jnp.eye(n_sub, dtype=gens.dtype), gens)
    return gbig.reshape(n, n_sub * d, n_sub * d)


def symm_loss_pallas(x, w1, b1, w2, gens):
    # Fold everything static into one (D, 128) operand in plain JAX:
    #   Wcomb = [ W1 | Gbig_0^T @ W1 | Gbig_1^T @ W1 | Gbig_2^T @ W1 ]
    gbig = build_block_diag_generators(gens, N_SUB)                    # (NGENS, D, D)
    k = jnp.einsum('nab,ah->nbh', gbig, w1,
                   precision=jax.lax.Precision.HIGHEST)                # (NGENS, D, H)
    k_flat = jnp.transpose(k, (1, 0, 2)).reshape(D, GH)                # (D, GH)
    wcomb = jnp.concatenate([w1, k_flat], axis=1)                      # (D, 128)
    params = jnp.concatenate([b1, w2], axis=0)                         # (2, H)

    cost = pl.CostEstimate(
        flops=2 * B * D * WCOMB_N + 2 * B * GH * NGENS,
        transcendentals=B * H,
        bytes_accessed=4 * (B * D + D * WCOMB_N + 2 * H + 1),
    )
    out = pl.pallas_call(
        symm_loss_kernel,
        out_shape=jax.ShapeDtypeStruct((1, 1), jnp.float32),
        in_specs=[pl.BlockSpec(memory_space=pltpu.MemorySpace.VMEM)] * 3,
        out_specs=pl.BlockSpec(memory_space=pltpu.MemorySpace.VMEM),
        cost_estimate=cost,
    )(x, wcomb, params)
    return out[0, 0]


# ---------------- reference (autograd path, mirrors the PyTorch module) -------
def model_apply(w1, b1, w2, b2, x):
    h = jnp.tanh(jnp.dot(x, w1, precision=jax.lax.Precision.HIGHEST) + b1[0])
    return jnp.dot(h, w2[0], precision=jax.lax.Precision.HIGHEST) + b2  # (B,)


def symm_loss_reference(x, w1, b1, w2, b2, gens):
    grads = jax.grad(lambda xx: jnp.sum(model_apply(w1, b1, w2, b2, xx)))(x)
    grads_r = grads.reshape(B, N_SUB, D_GEN)
    x_r = x.reshape(B, N_SUB, D_GEN)
    dt = jnp.einsum('nhd,bNh,bNd->nb', gens, grads_r, x_r,
                    precision=jax.lax.Precision.HIGHEST)
    return jnp.mean(dt ** 2)


# ---------------- main --------------------------------------------------------
if __name__ == "__main__":
    key = jax.random.PRNGKey(0)
    kx, kg, k1, kb1, k2 = jax.random.split(key, 5)

    x = jax.random.normal(kx, (B, D), dtype=jnp.float32)
    gens = jax.random.normal(kg, (NGENS, D_GEN, D_GEN), dtype=jnp.float32)

    # deterministic synthetic model parameters
    w1 = 0.3 * jax.random.normal(k1, (D, H), dtype=jnp.float32)
    b1 = 0.1 * jax.random.normal(kb1, (1, H), dtype=jnp.float32)
    w2 = 0.3 * jax.random.normal(k2, (1, H), dtype=jnp.float32)
    b2 = jnp.float32(0.1)   # does not affect the loss (only grads matter)

    loss = jax.jit(symm_loss_pallas)(x, w1, b1, w2, gens)
    loss = jax.block_until_ready(loss)

    ref = jax.block_until_ready(symm_loss_reference(x, w1, b1, w2, b2, gens))
    np.testing.assert_allclose(np.asarray(loss), np.asarray(ref),
                               rtol=1e-4, atol=1e-5)

    print("KERNEL_OK")
</pallas_src>

<mosaic_0001>
module attributes {stable_mosaic.version = 11 : i64} {
  func.func @symm_loss_kernel(%arg0: memref<8x16xf32, #tpu.memory_space<vmem>>, %arg1: memref<16x128xf32, #tpu.memory_space<vmem>>, %arg2: memref<2x32xf32, #tpu.memory_space<vmem>>, %arg3: memref<1x1xf32, #tpu.memory_space<vmem>>) attributes {dimension_semantics = [], scalar_prefetch = 0 : i64, scratch_operands = 0 : i64, tpu.core_type = #tpu.core_type<tc>} {
    %c0 = arith.constant 0 : index
    %c0_0 = arith.constant 0 : index
    %0 = vector.load %arg0[%c0, %c0_0] : memref<8x16xf32, #tpu.memory_space<vmem>>, vector<8x16xf32>
    %c0_1 = arith.constant 0 : index
    %c0_2 = arith.constant 0 : index
    %1 = vector.load %arg1[%c0_1, %c0_2] : memref<16x128xf32, #tpu.memory_space<vmem>>, vector<16x128xf32>
    %c0_3 = arith.constant 0 : index
    %c0_4 = arith.constant 0 : index
    %2 = vector.load %arg2[%c0_3, %c0_4] : memref<2x32xf32, #tpu.memory_space<vmem>>, vector<2x32xf32>
    %3 = vector.extract_strided_slice %2 {offsets = [0, 0], sizes = [1, 32], strides = [1, 1]} : vector<2x32xf32> to vector<1x32xf32>
    %4 = vector.extract_strided_slice %2 {offsets = [1, 0], sizes = [1, 32], strides = [1, 1]} : vector<2x32xf32> to vector<1x32xf32>
    %cst = arith.constant dense<0.000000e+00> : vector<8x128xf32>
    %5 = tpu.matmul %0, %1, %cst {dimension_numbers = #tpu.dot_dimension_numbers<[1], [0], [0], [1], [0, 0, 1, 1], [], []>} : vector<8x16xf32>, vector<16x128xf32>, vector<8x128xf32> -> vector<8x128xf32>
    %6 = vector.extract_strided_slice %5 {offsets = [0, 0], sizes = [8, 32], strides = [1, 1]} : vector<8x128xf32> to vector<8x32xf32>
    %7 = vector.broadcast %3 : vector<1x32xf32> to vector<8x32xf32>
    %8 = arith.addf %6, %7 : vector<8x32xf32>
    %9 = vector.extract_strided_slice %5 {offsets = [0, 32], sizes = [8, 96], strides = [1, 1]} : vector<8x128xf32> to vector<8x96xf32>
    %10 = math.tanh %8 : vector<8x32xf32>
    %11 = arith.mulf %10, %10 : vector<8x32xf32>
    %cst_5 = arith.constant 1.000000e+00 : f32
    %12 = vector.broadcast %cst_5 : f32 to vector<8x32xf32>
    %13 = arith.subf %12, %11 : vector<8x32xf32>
    %14 = vector.broadcast %4 : vector<1x32xf32> to vector<8x32xf32>
    %15 = arith.mulf %13, %14 : vector<8x32xf32>
    %16 = tpu.concatenate %15, %15, %15 in 1 : vector<8x32xf32>, vector<8x32xf32>, vector<8x32xf32> -> vector<8x96xf32>
    %17 = arith.mulf %9, %16 : vector<8x96xf32>
    %18 = tpu.iota {dimensions = array<i32: 0>} : vector<96x3xi32>
    %19 = tpu.iota {dimensions = array<i32: 1>} : vector<96x3xi32>
    %c32_i32 = arith.constant 32 : i32
    %20 = vector.broadcast %c32_i32 : i32 to vector<96x3xi32>
    %21 = arith.muli %19, %20 : vector<96x3xi32>
    %22 = arith.cmpi sge, %18, %21 : vector<96x3xi32>
    %c1_i32 = arith.constant 1 : i32
    %23 = vector.broadcast %c1_i32 : i32 to vector<96x3xi32>
    %24 = arith.addi %19, %23 : vector<96x3xi32>
    %c32_i32_6 = arith.constant 32 : i32
    %25 = vector.broadcast %c32_i32_6 : i32 to vector<96x3xi32>
    %26 = arith.muli %24, %25 : vector<96x3xi32>
    %27 = arith.cmpi slt, %18, %26 : vector<96x3xi32>
    %28 = arith.andi %22, %27 : vector<96x3xi1>
    %29 = arith.extui %28 : vector<96x3xi1> to vector<96x3xi32>
    %30 = arith.sitofp %29 : vector<96x3xi32> to vector<96x3xf32>
    %cst_7 = arith.constant dense<0.000000e+00> : vector<8x3xf32>
    %31 = tpu.matmul %17, %30, %cst_7 {dimension_numbers = #tpu.dot_dimension_numbers<[1], [0], [0], [1], [0, 0, 1, 1], [], []>} : vector<8x96xf32>, vector<96x3xf32>, vector<8x3xf32> -> vector<8x3xf32>
    %32 = arith.mulf %31, %31 : vector<8x3xf32>
    %33 = vector.shape_cast %32 : vector<8x3xf32> to vector<1x8x3xf32>
    %cst_8 = arith.constant dense<0.000000e+00> : vector<1xf32>
    %34 = vector.multi_reduction <add>, %33, %cst_8 [1, 2] : vector<1x8x3xf32> to vector<1xf32>
    %35 = vector.shape_cast %34 : vector<1xf32> to vector<1x1x1xf32>
    %36 = vector.extract %35[0, 0, 0] : f32 from vector<1x1x1xf32>
    %cst_9 = arith.constant 0.0416666679 : f32
    %37 = arith.mulf %36, %cst_9 : f32
    %38 = vector.broadcast %37 : f32 to vector<1x1xf32>
    %c0_10 = arith.constant 0 : index
    %c0_11 = arith.constant 0 : index
    %39 = vector.load %arg3[%c0_10, %c0_11] : memref<1x1xf32, #tpu.memory_space<vmem>>, vector<1x1xf32>
    tpu.vector_store %arg3[%c0_10, %c0_11], %38 {strides = array<i32>} : memref<1x1xf32, #tpu.memory_space<vmem>>, vector<1x1xf32>,
    return
  }
}

</mosaic_0001>

<bundles_post_ra>
// kernel: symm_loss_pallas.1
= control target key start
LH: loop header
LB: loop body
LE: loop exit
PB: predicated region body
PF: predicated region fallthrough
CT: control target
= control target key end

     0   :  { %v439_v2 = vmov 0.0|0.0   ;;  %vm440_vm0 = vmmov 0   ;;  %v441_v4 = vmov 0.0   ;;  %s569_s0 = inlined_call_operand.vmem [shape: f32[8,16], index: 0, kind: input, shape index: {}]   ;;  %s570_s1 = inlined_call_operand.vmem [shape: f32[16,128], index: 1, kind: input, shape index: {}]   ;;  %s571_s2 = inlined_call_operand.vmem [shape: f32[2,32], index: 2, kind: input, shape index: {}]   ;;  %s572_s3 = inlined_call_operand.hbm [shape: f32[1,1], index: 3, kind: output, shape index: {}]  }
   0x1   :  { %v16_v0 = vld [vmem:[%s570_s1] sm:$0xff]  ;;  %v17_v1 = vld [vmem:[%s570_s1 + $0x8] sm:$0xff]  ;;  %382 = vmatprep.subr.bf16.mxu0 %v439_v2  ;;  %352 = vmatprep.mubr.msk.f32.mxu0 %vm440_vm0, %v441_v4 }
   0x2   :  { %v383_v3 = vpack.c.bf16 %v17_v1, %v16_v0 }
   0x3   :  { %8 = vsyncpa [#allocation3], 0  ;;  %385 = vmatprep.subr.bf16.mxu1 %v439_v2  ;;  %379 = vmatprep.mubr.msk.f32.mxu1 %vm440_vm0, %v441_v4  ;;  %v15_v5 = vld [vmem:[%s569_s0] sm:$0xff]  ;;  %vm19_vm1 = vcmask 130048   ;;  %v93_v6 = vlaneseq  ;;  %s442_s0 = smov 32   ;;  %s443_s19 = smov 64  }
   0x4   :  { %384 = vmatpush3.bf16.msra.mxu0 %v383_v3  ;;  %v18_v9 = vld [vmem:[%s571_s2] sm:$0x3]  ;;  %vm113_vm3 = vcmask 261120   ;;  %vm115_vm5 = vcmask 523264   ;;  %v444_v34 = vmov 1.0|1.0  }
   0x5   :  { %v478_v7 = vshrl.u32 %v93_v6, 7  ;;  %v136_v20 = vand.u32 127, %v93_v6  ;;  %s445_s2 = smov 96   ;;  %s446_s20 = smov [#allocation2]  }
   0x6   :  { %s298_s21 = sshll.u32 %s446_s20, 4  ;;  %s299_s21 = int_to_ptr.vmem [resolvable:$true] %s298_s21 }
   0x7   :  { %353 = vmatmul.mubr.msk.f32.vlgmr.msra.gmra.mrb[0].mxu0 %vm19_vm1, %v15_v5  ;;  %v95_v8 = vsub.s32 0, %v478_v7  ;;  %v103_v14 = vsub.s32 1, %v478_v7  ;;  %v124_v21 = vadd.s32 8, %v478_v7  ;;  %v490_v22 = vmul.u32 32, %v136_v20  ;;  %s415_s24 = scalar_lea.vmem %s299_s21, 16  ;;  %s419_s25 = scalar_lea.vmem %s299_s21, 32 }
   0x8   :  { %v150_v23 = vadd.s32 1, %v136_v20  ;;  %v125_v24 = vadd.s32 16, %v478_v7  ;;  %v126_v26 = vadd.s32 24, %v478_v7  ;;  %v127_v28 = vadd.s32 32, %v478_v7  ;;  %p416_p0 = scmp.ne.s32.totalorder %s299_s21, %s415_s24  ;;  %p420_p1 = scmp.lt.s32.totalorder %s299_s21, %s299_s21 }
   0x9   :  { %v96_v10 = vrot.slane %v18_v9, %v95_v8  ;;  %v104_v17 = vrot.slane %v18_v9, %v103_v14  ;;  %vm138_vm2 = vcmp.ge.s32.totalorder %v478_v7, %v490_v22  ;;  %vm139_vm4 = vcmp.ge.s32.totalorder %v124_v21, %v490_v22  ;;  %p421_p2 = scmp.lt.s32.totalorder %s419_s25, %s415_s24 }
   0xa   :  { %v495_v25 = vmul.u32 32, %v150_v23  ;;  %vm140_vm9 = vcmp.ge.s32.totalorder %v125_v24, %v490_v22  ;;  %v128_v29 = vadd.s32 40, %v478_v7  ;;  %vm141_vm12 = vcmp.ge.s32.totalorder %v126_v26, %v490_v22 }
   0xb   :  { %v129_v32 = vadd.s32 48, %v478_v7  ;;  %vm142_vm0 = vcmp.ge.s32.totalorder %v127_v28, %v490_v22  ;;  %v130_v36 = vadd.s32 56, %v478_v7  ;;  %v131_v37 = vadd.s32 64, %v478_v7  ;;  %p422_p3 = por %p421_p2, %p420_p1 }
   0xc   :  { %vm152_vm6 = vcmp.lt.s32.totalorder %v478_v7, %v495_v25  ;;  %vm153_vm7 = vcmp.lt.s32.totalorder %v124_v21, %v495_v25  ;;  %vm154_vm10 = vcmp.lt.s32.totalorder %v125_v24, %v495_v25  ;;  %vm155_vm13 = vcmp.lt.s32.totalorder %v126_v26, %v495_v25 }
   0xd   :  { %vm164_vm8 = vmand %vm138_vm2, %vm152_vm6  ;;  %vm156_vm1 = vcmp.lt.s32.totalorder %v127_v28, %v495_v25  ;;  %v132_v39 = vadd.s32 72, %v478_v7  ;;  %v133_v41 = vadd.s32 80, %v478_v7  ;;  %v134_v42 = vadd.s32 88, %v478_v7  ;;  %p423_p4 = pnand %p422_p3, %p416_p0 }
   0xe   :  { %vm165_vm11 = vmand %vm139_vm4, %vm153_vm7  ;;  %vm157_vm4 = vcmp.lt.s32.totalorder %v128_v29, %v495_v25  ;;  %vm144_vm7 = vcmp.ge.s32.totalorder %v129_v32, %v490_v22 }
   0xf   :  { %vm386_vm14 = vmpackc.low %vm165_vm11, %vm164_vm8  ;;  %vm158_vm8 = vcmp.lt.s32.totalorder %v129_v32, %v495_v25  ;;  %vm159_vm11 = vcmp.lt.s32.totalorder %v130_v36, %v495_v25 }
  0x10   :  { %387 = vmatpush3.bf16.msk.msra.mxu1 %vm386_vm14, %v444_v34  ;;  %vm509_vm15 = vmand %vm140_vm9, %vm154_vm10  ;;  %vm145_vm10 = vcmp.ge.s32.totalorder %v130_v36, %v490_v22  ;;  %vm146_vm14 = vcmp.ge.s32.totalorder %v131_v37, %v490_v22 }
  0x11   :  { %388 = vmatprep.subr.bf16.mxu1 %v439_v2  ;;  %vm167_vm2 = vmand %vm141_vm12, %vm155_vm13 }
  0x12   :  { %vm525_vm6 = vmand %vm142_vm0, %vm156_vm1  ;;  %vm147_vm1 = vcmp.ge.s32.totalorder %v132_v39, %v490_v22 }
  0x13   :  { %vm537_vm13 = vmand %vm144_vm7, %vm158_vm8  ;;  %vm162_vm7 = vcmp.lt.s32.totalorder %v133_v41, %v495_v25  ;;  %vm149_vm8 = vcmp.ge.s32.totalorder %v134_v42, %v490_v22 }
  0x14   :  { %vm171_vm0 = vmand %vm145_vm10, %vm159_vm11 }
  0xda   :  { %v484_v11 = vpop.f32.mrb[0].mxu0 }
  0xdb   :  { %v97_v12 = vadd.f32 %v96_v10, %v484_v11  ;;  %v354_v13 = vpop.f32.mrb[1].mxu0 }
  0xdd   :  { %413 = vtanh.f32 %v97_v12 }
  0xe7   :  { %v414_v15 = vpop.eup %413 }
  0xe8   :  { %v99_v16 = vmul.f32 %v414_v15, %v414_v15 }
  0xea   :  { %v100_v18 = vsub.f32 1.0, %v99_v16 }
  0xec   :  { %v105_v19 = vmul.f32 %v104_v17, %v100_v18 }
  0xee   :  { %107 = vrot.lane.b32.xlu0 %v105_v19, %s442_s0 }
  0xf2   :  { %110 = vrot.lane.b32.xlu0 %v105_v19, %s443_s19 }
 0x160   :  { %v108_v27 = vpop.permute.xlu0 %107 }
 0x161   :  { %v114_v30 = vsel %vm113_vm3, %v105_v19, %v108_v27  ;;  %vm143_vm3 = vcmp.ge.s32.totalorder %v128_v29, %v490_v22 }
 0x162   :  { %vm169_vm9 = vmand %vm143_vm3, %vm157_vm4 }
 0x163   :  { %vm392_vm12 = vmpackc.low %vm169_vm9, %vm525_vm6  ;;  %vm148_vm6 = vcmp.ge.s32.totalorder %v133_v41, %v490_v22  ;;  %vm163_vm9 = vcmp.lt.s32.totalorder %v134_v42, %v495_v25 }
 0x164   :  { %v111_v31 = vpop.permute.xlu0 %110  ;;  %vm395_vm3 = vmpackc.low %vm171_vm0, %vm537_vm13  ;;  %vm290_vm0 = vcmask 0  }
 0x165   :  { %v116_v33 = vsel %vm115_vm5, %v114_v30, %v111_v31  ;;  %vm389_vm5 = vmpackc.low %vm167_vm2, %vm509_vm15  ;;  %vm160_vm15 = vcmp.lt.s32.totalorder %v131_v37, %v495_v25  ;;  %vm161_vm2 = vcmp.lt.s32.totalorder %v132_v39, %v495_v25 }
 0x166   :  { %118 = vrot.lane.b32.xlu1 %v116_v33, %s442_s0  ;;  %390 = vmatpush3.bf16.msk.msra.mxu1 %vm389_vm5, %v444_v34  ;;  %vm172_vm4 = vmand %vm146_vm14, %vm160_vm15  ;;  %vm203_vm14 = vcmask 785408   ;;  %vm277_vm15 = vcmask 23552  }
 0x167   :  { %391 = vmatprep.subr.bf16.mxu1 %v439_v2  ;;  %vm173_vm5 = vmand %vm147_vm1, %vm161_vm2 }
 0x168   :  { %vm398_vm10 = vmpackc.low %vm173_vm5, %vm172_vm4 }
 0x169   :  { %vm174_vm11 = vmand %vm148_vm6, %vm162_vm7 }
 0x16a   :  { %393 = vmatpush3.bf16.msk.msra.mxu1 %vm392_vm12, %v444_v34  ;;  %vm175_vm12 = vmand %vm149_vm8, %vm163_vm9 }
 0x16b   :  { %394 = vmatprep.subr.bf16.mxu1 %v439_v2  ;;  %vm401_vm13 = vmpackc.low %vm175_vm12, %vm174_vm11 }
 0x16e   :  { %396 = vmatpush3.bf16.msk.msra.mxu1 %vm395_vm3, %v444_v34 }
 0x16f   :  { %397 = vmatprep.subr.bf16.mxu1 %v439_v2 }
 0x172   :  { %399 = vmatpush3.bf16.msk.msra.mxu1 %vm398_vm10, %v444_v34 }
 0x173   :  { %400 = vmatprep.subr.bf16.mxu1 %v439_v2 }
 0x176   :  { %402 = vmatpush3.bf16.msk.msra.mxu1 %vm401_vm13, %v444_v34 }
 0x1d8   :  { %v119_v43 = vpop.permute.xlu1 %118 }
 0x1d9   :  { %v121_v44 = vmul.f32 %v119_v43, %v484_v11 }
 0x1db   :  { %201 = vrot.lane.b32.xlu1 %v121_v44, %s445_s2 }
 0x24d   :  { %v202_v45 = vpop.permute.xlu1 %201 }
 0x24e   :  { %380 = vmatmul.mubr.msk.f32.vlgmr.msra.gmra.mrb[0].mxu1 %vm203_vm14, %v202_v45 }
 0x321   :  { %v272_v46 = vpop.f32.mrb[0].mxu1 }
 0x322   :  { %v276_v47 = vmul.f32 %v272_v46, %v272_v46  ;;  %v381_v48 = vpop.f32.mrb[1].mxu1 }
 0x324   :  { %v278_v49 = vsel %vm277_vm15, %v276_v47, 0.0 }
 0x325   :  { %279 = vadd.xlane.f32.xlu0 %v278_v49 }
 0x3b2   :  { %v280_v50 = vpop.xlane.xlu0 %279 }
 0x3b3   :  { %v281_v51 = vrot.slane %v280_v50, 4 }
 0x3b5   :  { %v282_v52 = vadd.f32 %v281_v51, %v280_v50 }
 0x3b7   :  { %v283_v53 = vrot.slane %v282_v52, 2 }
 0x3b9   :  { %v284_v54 = vadd.f32 %v283_v53, %v282_v52 }
 0x3bb   :  { %v285_v55 = vrot.slane %v284_v54, 1 }
 0x3bd   :  { %v286_v56 = vadd.f32 %v285_v55, %v284_v54 }
 0x3bf   :  { %403 = vpush %v286_v56 }
 0x3f0   :  { %s404_s22 = spop %403 }
 0x3f1   :  { %s288_s23 = smul.f32 0.041666668, %s404_s22 }
 0x3f3   :  { %v289_v57 = vstv %s288_s23 }
 0x3f4   :  { %291 = vst.msk [vmem:[#allocation2] sm:$0x1] %vm290_vm0, %v289_v57 }
 0x3f5   :  { %426 = shalt.err (!%p423_p4)
}
 0x3f6   :  { %s427_s28 = scalar_lea.hbm %s572_s3, 16 }
 0x3f7   :  { %p428_p5 = scmp.ne.s32.totalorder %s572_s3, %s427_s28  ;;  %p431_p6 = scmp.lt.u32.totalorder %s427_s28, %s572_s3 }
 0x3f9   :  { %p433_p7 = pnand %p431_p6, %p428_p5 }
 0x3fb   :  { %436 = shalt.err (!%p433_p7)
}
 0x3fc   :  { %301 = dma.vmem_to_hbm [thread:$0]  %s299_s21, 16, %s572_s3, [#allocation3]  }
 0x3fd   :  { %437 = dma.done.wait [#allocation3], 16  }
 0x3fe   :  { %438 = vsyncadd [#allocation3], 4294967280 }
 0x3ff   :  { %305 = vsyncpa [#allocation3], 1 }

</bundles_post_ra>
